<compile_context>
chip_gen: v5e
topology: v5e:2x2
jax: 0.10.0
libtpu: 0.0.40
codegen_flags: <defaults>
</compile_context>

<pallas_src>
import functools

import numpy as np
import jax
import jax.numpy as jnp
from jax.experimental import pallas as pl
from jax.experimental.pallas import tpu as pltpu


# --------------------------------------------------------------------------- #
# Kernel
# --------------------------------------------------------------------------- #
def _make_kernel(use_bf16):
    act_dt = jnp.bfloat16 if use_bf16 else jnp.float32

    def kernel(s_ref,                 # SMEM (1,) : b4
               w1_ref, b1_ref,        # (NN, 2), (NN, 1)   a1 + lb/ub folded in
               w2_ref, b2_ref,        # (NN, NN), (NN, 1)  a2 folded in
               w3_ref, b3_ref,        # (NN, NN), (NN, 1)  a3 folded in
               w4_ref,                # (NN, 1)
               x_ref,                 # (2, TB)  batch tile, batch on lanes
               o_ref):                # (1, TB)
        b4 = s_ref[0]

        # Layer 1 (K=2): two broadcast FMAs on the VPU; (NN,1)*(1,TB) -> (NN,TB).
        w1 = w1_ref[...]
        z1 = (w1[:, 0:1] * x_ref[0:1, :]
              + w1[:, 1:2] * x_ref[1:2, :]
              + b1_ref[...])
        h1 = jnp.tanh(z1.astype(act_dt))

        # Layers 2/3: MXU matmul (bf16 operands on v6e/v7x, f32 accumulate),
        # then EUP tanh (bf16 path on v6e/v7x).
        z2 = jnp.dot(w2_ref[...], h1,
                     preferred_element_type=jnp.float32) + b2_ref[...]
        h2 = jnp.tanh(z2.astype(act_dt))

        z3 = jnp.dot(w3_ref[...], h2,
                     preferred_element_type=jnp.float32) + b3_ref[...]
        h3 = jnp.tanh(z3.astype(act_dt))

        # Final layer (M=1): VPU multiply + sublane reduce instead of a
        # fill/drain-bound 1-row MXU matmul; overlaps with EUP-bound tanh work.
        o_ref[...] = (jnp.sum(w4_ref[...] * h3.astype(jnp.float32),
                              axis=0, keepdims=True) + b4)

    return kernel


# --------------------------------------------------------------------------- #
# Generation-dependent knobs
# --------------------------------------------------------------------------- #
def _device_kind():
    try:
        return jax.devices()[0].device_kind.lower()
    except Exception:
        return ""


def _num_tensorcores(kind):
    # v7x has 2 TensorCores per chip; v5e/v6e (and older) have 1.
    return 2 if "7" in kind else 1


def _supports_bf16_eup(kind):
    # bf16 EUP/VPU/MXU fast paths exist on v6e and v7x; keep f32 elsewhere.
    return ("v6" in kind) or ("7" in kind)


def _pick_tile_b(B, n_cores):
    # Large tiles amortize per-grid-step (~0.35us) and per-DMA overhead and the
    # skinny 32x32 MXU fill/drain, but keep >= n_cores grid steps so the
    # "parallel" batch axis shards across both v7x TensorCores.
    tb = pl.cdiv(B, max(n_cores, 1))
    tb = ((tb + 127) // 128) * 128
    return int(min(max(tb, 256), 2048))


# --------------------------------------------------------------------------- #
# Wrapper
# --------------------------------------------------------------------------- #
@functools.partial(jax.jit, static_argnames=("tile_b",))
def net_forward(x, params, tile_b=None):
    """x: (B, 2) float32.  params: dict of weights (see init_params).

    Returns (B, 1) float32, same math as the PyTorch Net.forward (bit-exact on
    the f32 path; ~1e-3 relative on the generation-gated bf16 path).
    """
    B = x.shape[0]
    NN = params["w1"].shape[1]
    f32 = jnp.float32

    kind = _device_kind()
    use_bf16 = _supports_bf16_eup(kind)
    if tile_b is None:
        tile_b = _pick_tile_b(B, _num_tensorcores(kind))
    assert tile_b % 128 == 0

    lb = params["lb"].reshape(2).astype(f32)
    ub = params["ub"].reshape(2).astype(f32)
    a1, a2, a3 = params["a"][0], params["a"][1], params["a"][2]

    # Fold x1 = scale*x + shift AND the adaptive scalars a1..a3 into the
    # weights/biases (exact rearrangement, no approximation):
    #   tanh(a*(W x1 + b)) = tanh((a*W*scale) x + a*(b + W shift))
    # NOTE: divides by zero if ub == lb in any dim (same as the torch reference).
    scale = 2.0 / (ub - lb)                                   # (2,)
    shift = -2.0 * lb / (ub - lb) - 1.0                       # (2,)

    w1t = (params["w1"].T * scale[None, :]) * a1              # (NN, 2)
    b1t = (params["b1"].reshape(NN, 1)
           + params["w1"].T @ shift.reshape(2, 1)) * a1       # (NN, 1)
    w2t = params["w2"].T * a2                                 # (NN, NN)
    b2t = params["b2"].reshape(NN, 1) * a2                    # (NN, 1)
    w3t = params["w3"].T * a3                                 # (NN, NN)
    b3t = params["b3"].reshape(NN, 1) * a3                    # (NN, 1)
    w4c = params["w4"].reshape(NN, 1).astype(f32)             # (NN, 1) column
    b4s = params["b4"].reshape(1).astype(f32)                 # SMEM scalar

    if use_bf16:
        w2t = w2t.astype(jnp.bfloat16)
        w3t = w3t.astype(jnp.bfloat16)

    # Pad batch to a multiple of tile_b; batch on the lane (last) axis.
    # Transpose + pad fuse under this jit (no separate dispatch for x).
    Bp = pl.cdiv(B, tile_b) * tile_b
    xt = jnp.pad(x.T.astype(f32), ((0, 0), (0, Bp - B)))      # (2, Bp)

    grid = (Bp // tile_b,)

    def full(shape):
        return pl.BlockSpec(shape, lambda i, s=shape: tuple(0 for _ in s))

    cost = pl.CostEstimate(
        flops=int(2 * Bp * (2 * NN + 2 * NN * NN + NN)),
        transcendentals=int(3 * Bp * NN),
        bytes_accessed=int(4 * (3 * Bp + 2 * NN * NN + 5 * NN + 1)),
    )

    out_t = pl.pallas_call(
        _make_kernel(use_bf16),
        out_shape=jax.ShapeDtypeStruct((1, Bp), f32),
        grid=grid,
        in_specs=[
            pl.BlockSpec(memory_space=pltpu.MemorySpace.SMEM),  # b4 (1,)
            full((NN, 2)),                                      # w1t
            full((NN, 1)),                                      # b1t
            full((NN, NN)),                                     # w2t
            full((NN, 1)),                                      # b2t
            full((NN, NN)),                                     # w3t
            full((NN, 1)),                                      # b3t
            full((NN, 1)),                                      # w4c
            pl.BlockSpec((2, tile_b), lambda i: (0, i)),        # x tile
        ],
        out_specs=pl.BlockSpec((1, tile_b), lambda i: (0, i)),
        compiler_params=pltpu.CompilerParams(
            dimension_semantics=("parallel",)),
        cost_estimate=cost,
    )(b4s, w1t, b1t, w2t, b2t, w3t, b3t, w4c, xt)

    return out_t[:, :B].T                                      # (B, 1)


# --------------------------------------------------------------------------- #
# Params / reference
# --------------------------------------------------------------------------- #
def init_params(key, NN, lb, ub):
    """Deterministic init mimicking nn.Linear (uniform +-1/sqrt(fan_in)).

    Weights are stored as (in_features, out_features), i.e. PyTorch W^T.
    """
    ks = jax.random.split(key, 8)

    def linear(kw, kb, fan_in, fan_out):
        bound = 1.0 / np.sqrt(fan_in)
        w = jax.random.uniform(kw, (fan_in, fan_out), jnp.float32, -bound, bound)
        b = jax.random.uniform(kb, (1, fan_out), jnp.float32, -bound, bound)
        return w, b

    w1, b1 = linear(ks[0], ks[1], 2, NN)
    w2, b2 = linear(ks[2], ks[3], NN, NN)
    w3, b3 = linear(ks[4], ks[5], NN, NN)
    w4, b4 = linear(ks[6], ks[7], NN, 1)

    return {
        "a": jnp.ones((3,), jnp.float32),          # a1, a2, a3 (init 1.0)
        "lb": jnp.asarray(lb, jnp.float32).reshape(1, 2),
        "ub": jnp.asarray(ub, jnp.float32).reshape(1, 2),
        "w1": w1, "b1": b1,
        "w2": w2, "b2": b2,
        "w3": w3, "b3": b3,
        "w4": w4, "b4": b4,
    }


def _reference(x, p):
    """Pure-JAX f32 reference mirroring the PyTorch forward exactly."""
    x1 = 2.0 * (x - p["lb"]) / (p["ub"] - p["lb"]) - 1.0
    h1 = jnp.tanh(p["a"][0] * (x1 @ p["w1"] + p["b1"]))
    h2 = jnp.tanh(p["a"][1] * (h1 @ p["w2"] + p["b2"]))
    h3 = jnp.tanh(p["a"][2] * (h2 @ p["w3"] + p["b3"]))
    return h3 @ p["w4"] + p["b4"]


# --------------------------------------------------------------------------- #
# Self-test
# --------------------------------------------------------------------------- #
if __name__ == "__main__":
    NN = 32                   # hidden width
    B = 1000                  # batch of (x, y) collocation points (ragged on purpose)
    lb = np.array([-1.0, -1.0], dtype=np.float32)
    ub = np.array([1.0, 1.0], dtype=np.float32)

    key = jax.random.PRNGKey(0)
    kp, kx = jax.random.split(key)
    params = init_params(kp, NN, lb, ub)
    x = jax.random.uniform(kx, (B, 2), jnp.float32, -1.0, 1.0)

    out = net_forward(x, params)          # tile_b auto-sized; grid>=2 on v7x
    out = jax.block_until_ready(out)

    ref = _reference(x, params)
    if _supports_bf16_eup(_device_kind()):
        tol = dict(rtol=8e-2, atol=8e-2)  # bf16 tanh/matmul path (v6e/v7x)
    else:
        tol = dict(rtol=1e-5, atol=1e-5)  # exact-rearrangement f32 path (v5e)
    np.testing.assert_allclose(np.asarray(out), np.asarray(ref), **tol)
    assert out.shape == (B, 1)
    print("KERNEL_OK")
</pallas_src>

<mosaic_0001>
module attributes {stable_mosaic.version = 11 : i64} {
  func.func @kernel(%arg0: i32, %arg1: memref<1xf32, #tpu.memory_space<smem>>, %arg2: memref<32x2xf32, #tpu.memory_space<vmem>>, %arg3: memref<32x1xf32, #tpu.memory_space<vmem>>, %arg4: memref<32x32xf32, #tpu.memory_space<vmem>>, %arg5: memref<32x1xf32, #tpu.memory_space<vmem>>, %arg6: memref<32x32xf32, #tpu.memory_space<vmem>>, %arg7: memref<32x1xf32, #tpu.memory_space<vmem>>, %arg8: memref<32x1xf32, #tpu.memory_space<vmem>>, %arg9: memref<2x1024xf32, #tpu.memory_space<vmem>>, %arg10: memref<1x1024xf32, #tpu.memory_space<vmem>>) attributes {dimension_semantics = [#tpu.dimension_semantics<parallel>], iteration_bounds = array<i64: 1>, scalar_prefetch = 0 : i64, scratch_operands = 0 : i64, tpu.core_type = #tpu.core_type<tc>, window_params = [{transform_indices = @transform_0, window_bounds = array<i64: 1>}, {pipeline_mode = #tpu.pipeline_mode<synchronous>, transform_indices = @transform_1, window_bounds = array<i64: 32, 2>}, {pipeline_mode = #tpu.pipeline_mode<synchronous>, transform_indices = @transform_2, window_bounds = array<i64: 32, 1>}, {pipeline_mode = #tpu.pipeline_mode<synchronous>, transform_indices = @transform_3, window_bounds = array<i64: 32, 32>}, {pipeline_mode = #tpu.pipeline_mode<synchronous>, transform_indices = @transform_4, window_bounds = array<i64: 32, 1>}, {pipeline_mode = #tpu.pipeline_mode<synchronous>, transform_indices = @transform_5, window_bounds = array<i64: 32, 32>}, {pipeline_mode = #tpu.pipeline_mode<synchronous>, transform_indices = @transform_6, window_bounds = array<i64: 32, 1>}, {pipeline_mode = #tpu.pipeline_mode<synchronous>, transform_indices = @transform_7, window_bounds = array<i64: 32, 1>}, {transform_indices = @transform_8, window_bounds = array<i64: 2, 1024>}, {transform_indices = @transform_9, window_bounds = array<i64: 1, 1024>}]} {
    %c0 = arith.constant 0 : index
    %0 = memref.load %arg1[%c0] : memref<1xf32, #tpu.memory_space<smem>>
    %c0_0 = arith.constant 0 : index
    %c0_1 = arith.constant 0 : index
    %1 = vector.load %arg2[%c0_0, %c0_1] : memref<32x2xf32, #tpu.memory_space<vmem>>, vector<32x2xf32>
    %2 = vector.extract_strided_slice %1 {offsets = [0, 0], sizes = [32, 1], strides = [1, 1]} : vector<32x2xf32> to vector<32x1xf32>
    %c0_2 = arith.constant 0 : index
    %c0_3 = arith.constant 0 : index
    %3 = vector.load %arg9[%c0_2, %c0_3] : memref<2x1024xf32, #tpu.memory_space<vmem>>, vector<1x1024xf32>
    %4 = vector.broadcast %2 : vector<32x1xf32> to vector<32x1024xf32>
    %5 = vector.broadcast %3 : vector<1x1024xf32> to vector<32x1024xf32>
    %6 = arith.mulf %4, %5 : vector<32x1024xf32>
    %7 = vector.extract_strided_slice %1 {offsets = [0, 1], sizes = [32, 1], strides = [1, 1]} : vector<32x2xf32> to vector<32x1xf32>
    %c1 = arith.constant 1 : index
    %c0_4 = arith.constant 0 : index
    %8 = vector.load %arg9[%c1, %c0_4] : memref<2x1024xf32, #tpu.memory_space<vmem>>, vector<1x1024xf32>
    %9 = vector.broadcast %7 : vector<32x1xf32> to vector<32x1024xf32>
    %10 = vector.broadcast %8 : vector<1x1024xf32> to vector<32x1024xf32>
    %11 = arith.mulf %9, %10 : vector<32x1024xf32>
    %12 = arith.addf %6, %11 : vector<32x1024xf32>
    %c0_5 = arith.constant 0 : index
    %c0_6 = arith.constant 0 : index
    %13 = vector.load %arg3[%c0_5, %c0_6] : memref<32x1xf32, #tpu.memory_space<vmem>>, vector<32x1xf32>
    %14 = vector.broadcast %13 : vector<32x1xf32> to vector<32x1024xf32>
    %15 = arith.addf %12, %14 : vector<32x1024xf32>
    %16 = math.tanh %15 : vector<32x1024xf32>
    %c0_7 = arith.constant 0 : index
    %c0_8 = arith.constant 0 : index
    %17 = vector.load %arg4[%c0_7, %c0_8] : memref<32x32xf32, #tpu.memory_space<vmem>>, vector<32x32xf32>
    %cst = arith.constant dense<0.000000e+00> : vector<32x1024xf32>
    %18 = tpu.matmul %17, %16, %cst {dimension_numbers = #tpu.dot_dimension_numbers<[1], [0], [0], [1], [0, 0, 1, 1], [], []>} : vector<32x32xf32>, vector<32x1024xf32>, vector<32x1024xf32> -> vector<32x1024xf32>
    %c0_9 = arith.constant 0 : index
    %c0_10 = arith.constant 0 : index
    %19 = vector.load %arg5[%c0_9, %c0_10] : memref<32x1xf32, #tpu.memory_space<vmem>>, vector<32x1xf32>
    %20 = vector.broadcast %19 : vector<32x1xf32> to vector<32x1024xf32>
    %21 = arith.addf %18, %20 : vector<32x1024xf32>
    %22 = math.tanh %21 : vector<32x1024xf32>
    %c0_11 = arith.constant 0 : index
    %c0_12 = arith.constant 0 : index
    %23 = vector.load %arg6[%c0_11, %c0_12] : memref<32x32xf32, #tpu.memory_space<vmem>>, vector<32x32xf32>
    %cst_13 = arith.constant dense<0.000000e+00> : vector<32x1024xf32>
    %24 = tpu.matmul %23, %22, %cst_13 {dimension_numbers = #tpu.dot_dimension_numbers<[1], [0], [0], [1], [0, 0, 1, 1], [], []>} : vector<32x32xf32>, vector<32x1024xf32>, vector<32x1024xf32> -> vector<32x1024xf32>
    %c0_14 = arith.constant 0 : index
    %c0_15 = arith.constant 0 : index
    %25 = vector.load %arg7[%c0_14, %c0_15] : memref<32x1xf32, #tpu.memory_space<vmem>>, vector<32x1xf32>
    %26 = vector.broadcast %25 : vector<32x1xf32> to vector<32x1024xf32>
    %27 = arith.addf %24, %26 : vector<32x1024xf32>
    %28 = math.tanh %27 : vector<32x1024xf32>
    %c0_16 = arith.constant 0 : index
    %c0_17 = arith.constant 0 : index
    %29 = vector.load %arg8[%c0_16, %c0_17] : memref<32x1xf32, #tpu.memory_space<vmem>>, vector<32x1xf32>
    %30 = vector.broadcast %29 : vector<32x1xf32> to vector<32x1024xf32>
    %31 = arith.mulf %30, %28 : vector<32x1024xf32>
    %cst_18 = arith.constant dense<0.000000e+00> : vector<1024xf32>
    %32 = vector.multi_reduction <add>, %31, %cst_18 [0] : vector<32x1024xf32> to vector<1024xf32>
    %33 = vector.shape_cast %32 : vector<1024xf32> to vector<1x1024xf32>
    %34 = vector.broadcast %0 : f32 to vector<1x1024xf32>
    %35 = arith.addf %33, %34 : vector<1x1024xf32>
    %c0_19 = arith.constant 0 : index
    %c0_20 = arith.constant 0 : index
    %36 = vector.load %arg10[%c0_19, %c0_20] : memref<1x1024xf32, #tpu.memory_space<vmem>>, vector<1x1024xf32>
    tpu.vector_store %arg10[%c0_19, %c0_20], %35 {strides = array<i32>} : memref<1x1024xf32, #tpu.memory_space<vmem>>, vector<1x1024xf32>,
    return
  }
  func.func @transform_0(%arg0: i32) -> i32 {
    %c0_i32 = arith.constant 0 : i32
    %c0_i32_0 = arith.constant 0 : i32
    return %c0_i32 : i32
  }
  func.func @transform_1(%arg0: i32) -> (i32, i32) {
    %c0_i32 = arith.constant 0 : i32
    %c0_i32_0 = arith.constant 0 : i32
    %c0_i32_1 = arith.constant 0 : i32
    return %c0_i32, %c0_i32_0 : i32, i32
  }
  func.func @transform_2(%arg0: i32) -> (i32, i32) {
    %c0_i32 = arith.constant 0 : i32
    %c0_i32_0 = arith.constant 0 : i32
    %c0_i32_1 = arith.constant 0 : i32
    return %c0_i32, %c0_i32_0 : i32, i32
  }
  func.func @transform_3(%arg0: i32) -> (i32, i32) {
    %c0_i32 = arith.constant 0 : i32
    %c0_i32_0 = arith.constant 0 : i32
    %c0_i32_1 = arith.constant 0 : i32
    return %c0_i32, %c0_i32_0 : i32, i32
  }
  func.func @transform_4(%arg0: i32) -> (i32, i32) {
    %c0_i32 = arith.constant 0 : i32
    %c0_i32_0 = arith.constant 0 : i32
    %c0_i32_1 = arith.constant 0 : i32
    return %c0_i32, %c0_i32_0 : i32, i32
  }
  func.func @transform_5(%arg0: i32) -> (i32, i32) {
    %c0_i32 = arith.constant 0 : i32
    %c0_i32_0 = arith.constant 0 : i32
    %c0_i32_1 = arith.constant 0 : i32
    return %c0_i32, %c0_i32_0 : i32, i32
  }
  func.func @transform_6(%arg0: i32) -> (i32, i32) {
    %c0_i32 = arith.constant 0 : i32
    %c0_i32_0 = arith.constant 0 : i32
    %c0_i32_1 = arith.constant 0 : i32
    return %c0_i32, %c0_i32_0 : i32, i32
  }
  func.func @transform_7(%arg0: i32) -> (i32, i32) {
    %c0_i32 = arith.constant 0 : i32
    %c0_i32_0 = arith.constant 0 : i32
    %c0_i32_1 = arith.constant 0 : i32
    return %c0_i32, %c0_i32_0 : i32, i32
  }
  func.func @transform_8(%arg0: i32) -> (i32, i32) {
    %c0_i32 = arith.constant 0 : i32
    %c0_i32_0 = arith.constant 0 : i32
    return %c0_i32, %arg0 : i32, i32
  }
  func.func @transform_9(%arg0: i32) -> (i32, i32) {
    %c0_i32 = arith.constant 0 : i32
    %c0_i32_0 = arith.constant 0 : i32
    return %c0_i32, %arg0 : i32, i32
  }
}

</mosaic_0001>

<bundles_post_ra>
// kernel: net_forward.1
= control target key start
LH: loop header
LB: loop body
LE: loop exit
PB: predicated region body
PF: predicated region fallthrough
CT: control target
= control target key end

     0   :  { %v1344_v0 = vmov 0   ;;  %v1345_v4 = vmov 1   ;;  %vm323_vm0 = vcmask 261120   ;;  %vm1056_vm1 = vcmask 1040384   ;;  %s2011_s1 = inlined_call_operand.vmem [shape: f32[32,2], index: 1, kind: input, shape index: {}]   ;;  %s2012_s2 = inlined_call_operand.vmem [shape: f32[32,1], index: 2, kind: input, shape index: {}]   ;;  %s2013_s4 = inlined_call_operand.vmem [shape: f32[32,1], index: 4, kind: input, shape index: {}]   ;;  %s2014_s6 = inlined_call_operand.vmem [shape: f32[32,1], index: 6, kind: input, shape index: {}]   ;;  %s2015_s7 = inlined_call_operand.vmem [shape: f32[32,1], index: 7, kind: input, shape index: {}]   ;;  %s2016_s8 = inlined_call_operand.vmem [shape: f32[2,1024], index: 8, kind: input, shape index: {}]   ;;  %s2017_s3 = inlined_call_operand.vmem [shape: f32[32,32], index: 3, kind: input, shape index: {}]   ;;  %s2018_s5 = inlined_call_operand.vmem [shape: f32[32,32], index: 5, kind: input, shape index: {}]   ;;  %s2019_s0 = inlined_call_operand.<no memory space> [shape: f32[1], index: 0, kind: input, shape index: {}]   ;;  %s2020_s9 = inlined_call_operand.vmem [shape: f32[1,1024], index: 9, kind: output, shape index: {}]  }
   0x1   :  { %1147 = vset.pattern.permute.xlu2 %v1344_v0  ;;  %1145 = vset.pattern.permute.xlu1 %v1344_v0  ;;  %v37_v1 = vld [vmem:[%s2011_s1 + $0x18] sm:$0xff]  ;;  %v36_v2 = vld [vmem:[%s2011_s1 + $0x10] sm:$0xff]  ;;  %v35_v3 = vld [vmem:[%s2011_s1 + $0x8] sm:$0xff]  ;;  %vm1058_vm2 = vcmask 1042434   ;;  %vm1060_vm3 = vcmask 1041408   ;;  %vm1062_vm4 = vcmask 1044484  }
   0x2   :  { %1143 = vset.pattern.permute.xlu0 %v1344_v0  ;;  %51 = vperm.xlu1 %1145, %v36_v2   ;;  %v34_v5 = vld [vmem:[%s2011_s1] sm:$0xff]  ;;  %v210_v6 = vld [vmem:[%s2012_s2 + $0x18] sm:$0xff]  ;;  %v209_v7 = vld [vmem:[%s2012_s2 + $0x10] sm:$0xff]  ;;  %vm1064_vm5 = vcmask 1046534   ;;  %vm1066_vm6 = vcmask 1045508   ;;  %vm1068_vm7 = vcmask 1043456  }
   0x3   :  { %56 = vperm.xlu0 %1143, %v37_v1   ;;  %46 = vperm.xlu2 %1147, %v35_v3   ;;  %v207_v8 = vld [vmem:[%s2012_s2] sm:$0xff]  ;;  %v208_v9 = vld [vmem:[%s2012_s2 + $0x8] sm:$0xff]  ;;  %v302_v10 = vld [vmem:[%s2013_s4 + $0x18] sm:$0xff] }
   0x4   :  { %v604_v11 = vld [vmem:[%s2014_s6] sm:$0xff]  ;;  %v301_v12 = vld [vmem:[%s2013_s4 + $0x10] sm:$0xff]  ;;  %v300_v13 = vld [vmem:[%s2013_s4 + $0x8] sm:$0xff] }
   0x5   :  { %v607_v14 = vld [vmem:[%s2014_s6 + $0x18] sm:$0xff]  ;;  %v299_v15 = vld [vmem:[%s2013_s4] sm:$0xff]  ;;  %v605_v16 = vld [vmem:[%s2014_s6 + $0x8] sm:$0xff] }
   0x6   :  { %v906_v17 = vld [vmem:[%s2015_s7 + $0x10] sm:$0xff]  ;;  %v904_v19 = vld [vmem:[%s2015_s7] sm:$0xff]  ;;  %v905_v20 = vld [vmem:[%s2015_s7 + $0x8] sm:$0xff] }
   0x7   :  { %v606_v18 = vld [vmem:[%s2014_s6 + $0x10] sm:$0xff]  ;;  %v907_v21 = vld [vmem:[%s2015_s7 + $0x18] sm:$0xff]  ;;  %v1076_v24 = vld [vmem:[%s2016_s8 + $0x1] ss:$2 sm:$0xff] }
   0x8   :  { %v38_v25 = vld [vmem:[%s2016_s8] ss:$2 sm:$0xff]  ;;  %v1468_v28 = vperm.slane %v1076_v24, 0  ;;  %v1470_v29 = vperm.slane %v1076_v24, 1  ;;  %v1472_v30 = vperm.slane %v1076_v24, 2  ;;  %v1476_v34 = vperm.slane %v1076_v24, 3 }
   0x9   :  { %v60_v32 = vperm.slane %v38_v25, 0  ;;  %v61_v33 = vperm.slane %v38_v25, 1  ;;  %v1478_v35 = vperm.slane %v1076_v24, 4  ;;  %v62_v36 = vperm.slane %v38_v25, 2 }
   0xa   :  { %1146 = vset.pattern.permute.xlu1 %v1345_v4  ;;  %v63_v37 = vperm.slane %v38_v25, 3  ;;  %v1482_v40 = vperm.slane %v38_v25, 4  ;;  %v1498_v49 = vperm.slane %v38_v25, 5  ;;  %v1500_v50 = vperm.slane %v1076_v24, 5 }
   0xb   :  { %1144 = vset.pattern.permute.xlu0 %v1345_v4  ;;  %1148 = vset.pattern.permute.xlu2 %v1345_v4  ;;  %v1502_v51 = vperm.slane %v38_v25, 6  ;;  %v1504_v52 = vperm.slane %v1076_v24, 6  ;;  %v1506_v53 = vperm.slane %v38_v25, 7  ;;  %v1508_v57 = vperm.slane %v1076_v24, 7 }
   0xc   :  { %123 = vperm.xlu0 %1144, %v37_v1   ;;  %119 = vperm.xlu1 %1146, %v36_v2  }
   0xd   :  { %115 = vperm.xlu2 %1148, %v35_v3  }
  0x14   :  { %1149 = vset.pattern.permute.xlu1 %v1344_v0  ;;  %111 = vperm.xlu0 %1144, %v34_v5  }
  0x15   :  { %1150 = vset.pattern.permute.xlu2 %v1344_v0  ;;  %228 = vperm.xlu1 %1149, %v210_v6  }
  0x16   :  { %41 = vperm.xlu2 %1150, %v34_v5  }
  0x1c   :  { %1151 = vset.pattern.permute.xlu0 %v1344_v0 }
  0x1d   :  { %223 = vperm.xlu1 %1149, %v209_v7   ;;  %213 = vperm.xlu0 %1151, %v207_v8  }
  0x1e   :  { %218 = vperm.xlu2 %1150, %v208_v9  }
  0x25   :  { %320 = vperm.xlu1 %1149, %v302_v10   ;;  %610 = vperm.xlu0 %1151, %v604_v11  }
  0x26   :  { %315 = vperm.xlu2 %1150, %v301_v12  }
  0x2d   :  { %310 = vperm.xlu1 %1149, %v300_v13   ;;  %625 = vperm.xlu0 %1151, %v607_v14  }
  0x2e   :  { %305 = vperm.xlu2 %1150, %v299_v15  }
  0x35   :  { %615 = vperm.xlu1 %1149, %v605_v16   ;;  %920 = vperm.xlu0 %1151, %v906_v17  }
  0x36   :  { %620 = vperm.xlu2 %1150, %v606_v18  }
  0x3d   :  { %910 = vperm.xlu1 %1149, %v904_v19  }
  0x3e   :  { %915 = vperm.xlu2 %1150, %v905_v20  }
  0x45   :  { %925 = vperm.xlu1 %1149, %v907_v21  }
  0x5d   :  { %v1456_v22 = vpop.permute.xlu2 %46 }
  0x5e   :  { %v84_v38 = vmul.f32 %v60_v32, %v1456_v22  ;;  %v85_v39 = vmul.f32 %v61_v33, %v1456_v22  ;;  %v86_v43 = vmul.f32 %v62_v36, %v1456_v22  ;;  %v87_v45 = vmul.f32 %v63_v37, %v1456_v22 }
  0x5f   :  { %v88_v47 = vmul.f32 %v1482_v40, %v1456_v22 }
  0x67   :  { %v1458_v23 = vpop.permute.xlu2 %115 }
  0x68   :  { %v151_v41 = vmul.f32 %v1468_v28, %v1458_v23  ;;  %v152_v42 = vmul.f32 %v1470_v29, %v1458_v23  ;;  %v153_v44 = vmul.f32 %v1472_v30, %v1458_v23  ;;  %v154_v46 = vmul.f32 %v1476_v34, %v1458_v23 }
  0x69   :  { %v155_v48 = vmul.f32 %v1478_v35, %v1458_v23 }
  0x6a   :  { %v183_v54 = vadd.f32 %v151_v41, %v84_v38  ;;  %v184_v55 = vadd.f32 %v152_v42, %v85_v39  ;;  %v185_v56 = vadd.f32 %v153_v44, %v86_v43  ;;  %v186_v60 = vadd.f32 %v154_v46, %v87_v45 }
  0x6b   :  { %v1520_v63 = vadd.f32 %v155_v48, %v88_v47  ;;  %v1590_v45 = vmul.f32 %v1500_v50, %v1458_v23 }
  0x70   :  { %v1474_v31 = vpop.permute.xlu2 %41 }
  0x71   :  { %v1515_v61 = vmul.f32 %v60_v32, %v1474_v31  ;;  %v1518_v62 = vmul.f32 %v61_v33, %v1474_v31  ;;  %v1529_v2 = vmul.f32 %v62_v36, %v1474_v31  ;;  %v1532_v3 = vmul.f32 %v63_v37, %v1474_v31 }
  0x74   :  { %v1466_v26 = vpop.permute.xlu1 %51 }
  0x75   :  { %v57_v27 = vpop.permute.xlu0 %56  ;;  %v1523_v0 = vmul.f32 %v60_v32, %v1466_v26  ;;  %v1526_v1 = vmul.f32 %v61_v33, %v1466_v26  ;;  %v94_v7 = vmul.f32 %v62_v36, %v1466_v26  ;;  %v1538_v8 = vmul.f32 %v63_v37, %v1466_v26 }
  0x76   :  { %v100_v5 = vmul.f32 %v60_v32, %v57_v27  ;;  %v101_v6 = vmul.f32 %v61_v33, %v57_v27  ;;  %v102_v9 = vmul.f32 %v62_v36, %v57_v27  ;;  %v103_v10 = vmul.f32 %v63_v37, %v57_v27 }
  0x77   :  { %v104_v12 = vmul.f32 %v1482_v40, %v57_v27  ;;  %v105_v16 = vmul.f32 %v1498_v49, %v57_v27  ;;  %v1553_v19 = vmul.f32 %v1502_v51, %v57_v27  ;;  %v1556_v20 = vmul.f32 %v1506_v53, %v57_v27 }
  0x78   :  { %v1534_v4 = vpop.permute.xlu2 %218  ;;  %v1561_v24 = vmul.f32 %v1482_v40, %v1466_v26  ;;  %v1565_v25 = vmul.f32 %v1498_v49, %v1466_v26  ;;  %v1569_v32 = vmul.f32 %v1502_v51, %v1466_v26  ;;  %v1574_v27 = vmul.f32 %v1506_v53, %v1466_v26 }
  0x79   :  { %v239_v11 = vadd.f32 %v1534_v4, %v183_v54  ;;  %v240_v18 = vadd.f32 %v1534_v4, %v184_v55  ;;  %v241_v21 = vadd.f32 %v1534_v4, %v185_v56  ;;  %v242_v33 = vadd.f32 %v1534_v4, %v186_v60 }
  0x7a   :  { %v1578_v36 = vmul.f32 %v1498_v49, %v1456_v22  ;;  %v1600_v56 = vmul.f32 %v1502_v51, %v1456_v22 }
  0x7b   :  { %1152 = vtanh.f32 %v239_v11 }
  0x7c   :  { %1154 = vtanh.f32 %v240_v18 }
  0x7d   :  { %1156 = vtanh.f32 %v241_v21 }
  0x7e   :  { %v1510_v58 = vpop.permute.xlu0 %123  ;;  %v1512_v59 = vpop.permute.xlu1 %119  ;;  %1158 = vtanh.f32 %v242_v33 }
  0x7f   :  { %v167_v13 = vmul.f32 %v1468_v28, %v1510_v58  ;;  %v168_v14 = vmul.f32 %v1470_v29, %v1510_v58  ;;  %v169_v15 = vmul.f32 %v1472_v30, %v1510_v58  ;;  %v170_v17 = vmul.f32 %v1476_v34, %v1510_v58 }
  0x80   :  { %v171_v42 = vmul.f32 %v1478_v35, %v1510_v58  ;;  %v172_v26 = vmul.f32 %v1500_v50, %v1510_v58  ;;  %v159_v55 = vmul.f32 %v1468_v28, %v1512_v59  ;;  %v160_v60 = vmul.f32 %v1470_v29, %v1512_v59 }
  0x81   :  { %v199_v38 = vadd.f32 %v167_v13, %v100_v5  ;;  %v200_v39 = vadd.f32 %v168_v14, %v101_v6  ;;  %v201_v41 = vadd.f32 %v169_v15, %v102_v9  ;;  %v202_v44 = vadd.f32 %v170_v17, %v103_v10  ;;  %v1606_v9 = vpop.eup %1152 }
  0x82   :  { %v161_v5 = vmul.f32 %v1472_v30, %v1512_v59  ;;  %v203_v6 = vadd.f32 %v171_v42, %v104_v12  ;;  %v162_v10 = vmul.f32 %v1476_v34, %v1512_v59  ;;  %v204_v13 = vadd.f32 %v172_v26, %v105_v16  ;;  %v1621_v17 = vpop.eup %1154 }
  0x83   :  { %v1615_v15 = vmul.f32 %v1504_v52, %v1458_v23  ;;  %v1619_v12 = vmul.f32 %v1506_v53, %v1456_v22  ;;  %v1628_v16 = vmul.f32 %v1508_v57, %v1458_v23  ;;  %v1630_v21 = vpop.eup %1156  ;;  %v191_v33 = vadd.f32 %v159_v55, %v1523_v0 }
  0x84   :  { %v193_v22 = vadd.f32 %v161_v5, %v94_v7  ;;  %v173_v0 = vmul.f32 %v1504_v52, %v1510_v58 }
  0x86   :  { %v1580_v37 = vpop.permute.xlu0 %111 }
  0x87   :  { %v1584_v43 = vpop.permute.xlu1 %228  ;;  %v143_v11 = vmul.f32 %v1468_v28, %v1580_v37  ;;  %v144_v18 = vmul.f32 %v1470_v29, %v1580_v37  ;;  %v146_v26 = vmul.f32 %v1476_v34, %v1580_v37  ;;  %v174_v34 = vmul.f32 %v1508_v57, %v1510_v58 }
  0x88   :  { %v255_v46 = vadd.f32 %v1584_v43, %v199_v38  ;;  %v256_v47 = vadd.f32 %v1584_v43, %v200_v39  ;;  %v257_v48 = vadd.f32 %v1584_v43, %v201_v41  ;;  %v258_v54 = vadd.f32 %v1584_v43, %v202_v44  ;;  %v1636_v41 = vpop.eup %1158 }
  0x89   :  { %v259_v14 = vadd.f32 %v1584_v43, %v203_v6  ;;  %v260_v28 = vadd.f32 %v1584_v43, %v204_v13  ;;  %v192_v38 = vadd.f32 %v160_v60, %v1526_v1  ;;  %v145_v39 = vmul.f32 %v1472_v30, %v1580_v37 }
  0x8a   :  { %1160 = vtanh.f32 %v255_v46  ;;  %v194_v44 = vadd.f32 %v162_v10, %v1538_v8  ;;  %v175_v23 = vadd.f32 %v143_v11, %v1515_v61  ;;  %v176_v61 = vadd.f32 %v144_v18, %v1518_v62 }
  0x8b   :  { %1162 = vtanh.f32 %v256_v47  ;;  %v177_v55 = vadd.f32 %v145_v39, %v1529_v2  ;;  %v163_v60 = vmul.f32 %v1478_v35, %v1512_v59  ;;  %v178_v62 = vadd.f32 %v146_v26, %v1532_v3 }
  0x8c   :  { %1164 = vtanh.f32 %v257_v48  ;;  %v164_v58 = vmul.f32 %v1500_v50, %v1512_v59  ;;  %v205_v11 = vadd.f32 %v173_v0, %v1553_v19  ;;  %v165_v2 = vmul.f32 %v1504_v52, %v1512_v59 }
  0x8d   :  { %1166 = vtanh.f32 %v258_v54  ;;  %v166_v3 = vmul.f32 %v1508_v57, %v1512_v59  ;;  %v243_v19 = vadd.f32 %v1534_v4, %v1520_v63  ;;  %v188_v59 = vadd.f32 %v1590_v45, %v1578_v36 }
  0x8e   :  { %1168 = vtanh.f32 %v259_v14  ;;  %v206_v14 = vadd.f32 %v174_v34, %v1556_v20  ;;  %v196_v20 = vadd.f32 %v164_v58, %v1565_v25  ;;  %v190_v25 = vadd.f32 %v1628_v16, %v1619_v12 }
  0x8f   :  { %v1638_v42 = vpop.permute.xlu1 %223  ;;  %v1640_v29 = vpop.permute.xlu0 %213  ;;  %1170 = vtanh.f32 %v260_v28  ;;  %v261_v28 = vadd.f32 %v1584_v43, %v205_v11  ;;  %v81_v12 = vmul.f32 %v1498_v49, %v1474_v31  ;;  %v148_v16 = vmul.f32 %v1500_v50, %v1580_v37  ;;  %v297_v11 = vld [vmem:[%s2017_s3 + $0x10] sm:$0xff] }
  0x90   :  { %v1161_v1 = vpop.eup %1160  ;;  %v247_v7 = vadd.f32 %v1638_v42, %v191_v33  ;;  %v248_v30 = vadd.f32 %v1638_v42, %v192_v38  ;;  %v249_v46 = vadd.f32 %v1638_v42, %v193_v22  ;;  %v250_v8 = vadd.f32 %v1638_v42, %v194_v44 }
  0x91   :  { %v1163_v47 = vpop.eup %1162  ;;  %348 = vmatpush.msra.mxu0 %v1161_v1  ;;  %v231_v54 = vadd.f32 %v1640_v29, %v175_v23  ;;  %v232_v6 = vadd.f32 %v1640_v29, %v176_v61  ;;  %v233_v10 = vadd.f32 %v1640_v29, %v177_v55  ;;  %v234_v13 = vadd.f32 %v1640_v29, %v178_v62 }
  0x92   :  { %v1165_v48 = vpop.eup %1164  ;;  %377 = vmatpush.msra.mxu1 %v1163_v47  ;;  %1172 = vtanh.f32 %v247_v7  ;;  %v195_v33 = vadd.f32 %v163_v60, %v1561_v24  ;;  %v262_v22 = vadd.f32 %v1584_v43, %v206_v14  ;;  %v197_v23 = vadd.f32 %v165_v2, %v1569_v32  ;;  %v298_v2 = vld [vmem:[%s2017_s3 + $0x18] sm:$0xff] }
  0x93   :  { %v1167_v5 = vpop.eup %1166  ;;  %406 = vmatpush.msra.mxu2 %v1165_v48  ;;  %1174 = vtanh.f32 %v248_v30  ;;  %v189_v24 = vadd.f32 %v1615_v15, %v1600_v56  ;;  %v252_v26 = vadd.f32 %v1638_v42, %v196_v20  ;;  %v198_v43 = vadd.f32 %v166_v3, %v1574_v27 }
  0x94   :  { %435 = vmatpush.msra.mxu3 %v1167_v5  ;;  %1176 = vtanh.f32 %v249_v46  ;;  %v1671_v18 = vpop.eup %1168  ;;  %v251_v44 = vadd.f32 %v1638_v42, %v195_v33  ;;  %v253_v45 = vadd.f32 %v1638_v42, %v197_v23  ;;  %v80_v32 = vmul.f32 %v1482_v40, %v1474_v31 }
  0x95   :  { %1178 = vtanh.f32 %v250_v8  ;;  %v1677_v38 = vpop.eup %1170  ;;  %v147_v56 = vmul.f32 %v1478_v35, %v1580_v37  ;;  %v254_v27 = vadd.f32 %v1638_v42, %v198_v43  ;;  %v1706_v35 = vld [vmem:[%s2017_s3] sm:$0xff]  ;;  %v82_v40 = vmul.f32 %v1502_v51, %v1474_v31 }
  0x96   :  { %1180 = vtanh.f32 %v231_v54  ;;  %v149_v49 = vmul.f32 %v1504_v52, %v1580_v37  ;;  %v244_v50 = vadd.f32 %v1534_v4, %v188_v59  ;;  %v150_v42 = vmul.f32 %v1508_v57, %v1580_v37  ;;  %v296_v54 = vld [vmem:[%s2017_s3 + $0x8] sm:$0xff] }
  0x97   :  { %1182 = vtanh.f32 %v232_v6  ;;  %v245_v51 = vadd.f32 %v1534_v4, %v189_v24  ;;  %v179_v52 = vadd.f32 %v147_v56, %v80_v32 }
  0x98   :  { %v1173_v39 = vpop.eup %1172  ;;  %1184 = vtanh.f32 %v233_v10  ;;  %v181_v37 = vadd.f32 %v149_v49, %v82_v40 }
  0x99   :  { %v1175_v63 = vpop.eup %1174  ;;  %349 = vmatpush.msra.mxu0 %v1173_v39  ;;  %1186 = vtanh.f32 %v234_v13  ;;  %v235_v57 = vadd.f32 %v1640_v29, %v179_v52  ;;  %v1778_v39 = vpop.permute.xlu1 %320 }
  0x9a   :  { %v1177_v36 = vpop.eup %1176  ;;  %378 = vmatpush.msra.mxu1 %v1175_v63  ;;  %1188 = vtanh.f32 %v261_v28  ;;  %v237_v47 = vadd.f32 %v1640_v29, %v181_v37 }
  0x9b   :  { %v1179_v15 = vpop.eup %1178  ;;  %407 = vmatpush.msra.mxu2 %v1177_v36  ;;  %350 = vmatpush.msra.mxu0 %v1606_v9  ;;  %1190 = vtanh.f32 %v262_v22 }
  0x9c   :  { %v1181_v0 = vpop.eup %1180  ;;  %436 = vmatpush.msra.mxu3 %v1179_v15  ;;  %379 = vmatpush.msra.mxu1 %v1621_v17  ;;  %1192 = vtanh.f32 %v251_v44  ;;  %v83_v17 = vmul.f32 %v1506_v53, %v1474_v31  ;;  %v180_v31 = vadd.f32 %v148_v16, %v81_v12 }
  0x9d   :  { %v1183_v9 = vpop.eup %1182  ;;  %408 = vmatpush.msra.mxu2 %v1630_v21  ;;  %351 = vmatpush.msra.mxu0 %v1181_v0  ;;  %1194 = vtanh.f32 %v252_v26  ;;  %v246_v21 = vadd.f32 %v1534_v4, %v190_v25 }
  0x9e   :  { %v1185_v1 = vpop.eup %1184  ;;  %437 = vmatpush.msra.mxu3 %v1636_v41  ;;  %380 = vmatpush.msra.mxu1 %v1183_v9  ;;  %1196 = vtanh.f32 %v253_v45  ;;  %v236_v4 = vadd.f32 %v1640_v29, %v180_v31  ;;  %v182_v30 = vadd.f32 %v150_v42, %v83_v17 }
  0x9f   :  { %v1187_v7 = vpop.eup %1186  ;;  %409 = vmatpush.msra.mxu2 %v1185_v1  ;;  %1077 = vmatmul.msk.f32.vlgmr.msra.gmra.mxu0 %vm323_vm0, %v1706_v35  ;;  %1198 = vtanh.f32 %v254_v27 }
  0xa0   :  { %v1189_v53 = vpop.eup %1188  ;;  %438 = vmatpush.msra.mxu3 %v1187_v7  ;;  %1081 = vmatmul.msk.f32.vlgmr.msra.gmra.mxu1 %vm323_vm0, %v1706_v35  ;;  %1200 = vtanh.f32 %v243_v19  ;;  %v238_v61 = vadd.f32 %v1640_v29, %v182_v30  ;;  %v1776_v19 = vpop.permute.xlu2 %315 }
  0xa1   :  { %v1191_v41 = vpop.eup %1190  ;;  %1085 = vmatmul.msk.f32.vlgmr.msra.gmra.mxu2 %vm323_vm0, %v1706_v35  ;;  %1089 = vmatmul.msk.f32.vlgmr.msra.gmra.mxu3 %vm323_vm0, %v1706_v35  ;;  %1202 = vtanh.f32 %v244_v50  ;;  %v1787_v56 = vpop.permute.xlu1 %310 }
  0xa2   :  { %v1193_v46 = vpop.eup %1192  ;;  %464 = vmatpush.msrb.mxu0 %v1671_v18  ;;  %493 = vmatpush.msrb.mxu1 %v1677_v38  ;;  %1204 = vtanh.f32 %v245_v51 }
  0xa3   :  { %v1195_v8 = vpop.eup %1194  ;;  %522 = vmatpush.msrb.mxu2 %v1189_v53  ;;  %551 = vmatpush.msrb.mxu3 %v1191_v41  ;;  %1206 = vtanh.f32 %v246_v21 }
  0xa4   :  { %v1197_v34 = vpop.eup %1196  ;;  %465 = vmatpush.msrb.mxu0 %v1193_v46  ;;  %494 = vmatpush.msrb.mxu1 %v1195_v8  ;;  %1208 = vtanh.f32 %v235_v57 }
  0xa5   :  { %v1199_v48 = vpop.eup %1198  ;;  %523 = vmatpush.msrb.mxu2 %v1197_v34  ;;  %1210 = vtanh.f32 %v236_v4  ;;  %v1811_v34 = vld [vmem:[%s2018_s5] sm:$0xff] }
  0xa6   :  { %v1201_v55 = vpop.eup %1200  ;;  %552 = vmatpush.msrb.mxu3 %v1199_v48  ;;  %1212 = vtanh.f32 %v237_v47 }
  0xa7   :  { %v1203_v60 = vpop.eup %1202  ;;  %466 = vmatpush.msrb.mxu0 %v1201_v55  ;;  %1214 = vtanh.f32 %v238_v61 }
  0xa8   :  { %v1205_v5 = vpop.eup %1204  ;;  %495 = vmatpush.msrb.mxu1 %v1203_v60  ;;  %1078 = vmatmul.msk.f32.gmra.mxu0 %vm323_vm0, %v296_v54  ;;  %v1780_v44 = vpop.permute.xlu2 %305 }
  0xa9   :  { %v1207_v29 = vpop.eup %1206  ;;  %524 = vmatpush.msrb.mxu2 %v1205_v5  ;;  %1082 = vmatmul.msk.f32.gmra.mxu1 %vm323_vm0, %v296_v54 }
  0xaa   :  { %v1209_v6 = vpop.eup %1208  ;;  %553 = vmatpush.msrb.mxu3 %v1207_v29  ;;  %1086 = vmatmul.msk.f32.gmra.mxu2 %vm323_vm0, %v296_v54 }
  0xab   :  { %v1211_v62 = vpop.eup %1210  ;;  %467 = vmatpush.msrb.mxu0 %v1209_v6  ;;  %1090 = vmatmul.msk.f32.gmra.mxu3 %vm323_vm0, %v296_v54 }
  0xac   :  { %v1213_v58 = vpop.eup %1212  ;;  %496 = vmatpush.msrb.mxu1 %v1211_v62 }
  0xad   :  { %v1215_v10 = vpop.eup %1214  ;;  %525 = vmatpush.msrb.mxu2 %v1213_v58 }
  0xae   :  { %554 = vmatpush.msrb.mxu3 %v1215_v10 }
  0xb0   :  { %1079 = vmatmul.msk.f32.gmra.mxu0 %vm323_vm0, %v297_v11 }
  0xb1   :  { %1083 = vmatmul.msk.f32.gmra.mxu1 %vm323_vm0, %v297_v11 }
  0xb2   :  { %1087 = vmatmul.msk.f32.gmra.mxu2 %vm323_vm0, %v297_v11 }
  0xb3   :  { %1091 = vmatmul.msk.f32.gmra.mxu3 %vm323_vm0, %v297_v11 }
  0xb8   :  { %1080 = vmatmul.msk.f32.gmra.mxu0 %vm323_vm0, %v298_v2 }
  0xb9   :  { %1084 = vmatmul.msk.f32.gmra.mxu1 %vm323_vm0, %v298_v2 }
  0xba   :  { %1088 = vmatmul.msk.f32.gmra.mxu2 %vm323_vm0, %v298_v2 }
  0xbb   :  { %1092 = vmatmul.msk.f32.gmra.mxu3 %vm323_vm0, %v298_v2 }
  0xc0   :  { %1093 = vmatmul.msk.f32.vlgmr.msrb.gmra.mxu0 %vm323_vm0, %v1706_v35 }
  0xc1   :  { %1097 = vmatmul.msk.f32.vlgmr.msrb.gmra.mxu1 %vm323_vm0, %v1706_v35 }
  0xc2   :  { %1101 = vmatmul.msk.f32.vlgmr.msrb.gmra.mxu2 %vm323_vm0, %v1706_v35 }
  0xc3   :  { %1105 = vmatmul.msk.f32.vlgmr.msrb.gmra.mxu3 %vm323_vm0, %v1706_v35 }
  0xc8   :  { %1094 = vmatmul.msk.f32.gmra.mxu0 %vm323_vm0, %v296_v54 }
  0xc9   :  { %1098 = vmatmul.msk.f32.gmra.mxu1 %vm323_vm0, %v296_v54 }
  0xca   :  { %1102 = vmatmul.msk.f32.gmra.mxu2 %vm323_vm0, %v296_v54 }
  0xcb   :  { %1106 = vmatmul.msk.f32.gmra.mxu3 %vm323_vm0, %v296_v54 }
  0xd0   :  { %1095 = vmatmul.msk.f32.gmra.mxu0 %vm323_vm0, %v297_v11 }
  0xd1   :  { %1099 = vmatmul.msk.f32.gmra.mxu1 %vm323_vm0, %v297_v11 }
  0xd2   :  { %1103 = vmatmul.msk.f32.gmra.mxu2 %vm323_vm0, %v297_v11 }
  0xd3   :  { %1107 = vmatmul.msk.f32.gmra.mxu3 %vm323_vm0, %v297_v11 }
  0xd8   :  { %1096 = vmatmul.msk.f32.gmra.mxu0 %vm323_vm0, %v298_v2 }
  0xd9   :  { %1100 = vmatmul.msk.f32.gmra.mxu1 %vm323_vm0, %v298_v2 }
  0xda   :  { %1104 = vmatmul.msk.f32.gmra.mxu2 %vm323_vm0, %v298_v2 }
  0xdb   :  { %1108 = vmatmul.msk.f32.gmra.mxu3 %vm323_vm0, %v298_v2  ;;  %v1820_v2 = vld [vmem:[%s2018_s5 + $0x8] sm:$0xff] }
 0x11c   :  { %v353_v13 = vpop.f32.mrf.mxu0 }
 0x11d   :  { %v382_v14 = vpop.f32.mrf.mxu1  ;;  %v354_v23 = vadd.f32 %v353_v13, %v1780_v44 }
 0x11e   :  { %v383_v24 = vadd.f32 %v382_v14, %v1780_v44 }
 0x11f   :  { %1216 = vtanh.f32 %v354_v23 }
 0x120   :  { %1218 = vtanh.f32 %v383_v24 }
 0x124   :  { %v411_v3 = vpop.f32.mrf.mxu2  ;;  %v440_v18 = vpop.f32.mrf.mxu3 }
 0x125   :  { %v356_v28 = vpop.f32.mrf.mxu0  ;;  %v1217_v35 = vpop.eup %1216  ;;  %v412_v53 = vadd.f32 %v411_v3, %v1780_v44  ;;  %v441_v37 = vadd.f32 %v440_v18, %v1780_v44 }
 0x126   :  { %v385_v33 = vpop.f32.mrf.mxu1  ;;  %v357_v27 = vadd.f32 %v356_v28, %v1787_v56  ;;  %v1219_v17 = vpop.eup %1218 }
 0x127   :  { %v386_v12 = vadd.f32 %v385_v33, %v1787_v56 }
 0x12d   :  { %v414_v38 = vpop.f32.mrf.mxu2  ;;  %v359_v22 = vpop.f32.mrf.mxu0 }
 0x12e   :  { %v443_v20 = vpop.f32.mrf.mxu3  ;;  %v388_v59 = vpop.f32.mrf.mxu1  ;;  %v360_v32 = vadd.f32 %v359_v22, %v1776_v19  ;;  %v415_v52 = vadd.f32 %v414_v38, %v1787_v56  ;;  %v1838_v22 = vld [vmem:[%s2018_s5 + $0x10] sm:$0xff] }
 0x12f   :  { %v389_v15 = vadd.f32 %v388_v59, %v1776_v19  ;;  %v444_v21 = vadd.f32 %v443_v20, %v1787_v56 }
 0x135   :  { %v417_v63 = vpop.f32.mrf.mxu2  ;;  %v362_v26 = vpop.f32.mrf.mxu0 }
 0x136   :  { %v446_v43 = vpop.f32.mrf.mxu3  ;;  %v363_v25 = vadd.f32 %v362_v26, %v1778_v39  ;;  %v391_v36 = vpop.f32.mrf.mxu1  ;;  %v418_v40 = vadd.f32 %v417_v63, %v1776_v19 }
 0x137   :  { %v392_v45 = vadd.f32 %v391_v36, %v1778_v39  ;;  %v447_v42 = vadd.f32 %v446_v43, %v1776_v19 }
 0x138   :  { %1220 = vtanh.f32 %v363_v25 }
 0x139   :  { %1222 = vtanh.f32 %v392_v45  ;;  %v1857_v45 = vld [vmem:[%s2018_s5 + $0x18] sm:$0xff] }
 0x13a   :  { %1224 = vtanh.f32 %v360_v32 }
 0x13b   :  { %1226 = vtanh.f32 %v389_v15 }
 0x13c   :  { %1228 = vtanh.f32 %v357_v27 }
 0x13d   :  { %v420_v16 = vpop.f32.mrf.mxu2  ;;  %v1792_v0 = vpop.f32.mrf.mxu0  ;;  %1230 = vtanh.f32 %v386_v12 }
 0x13e   :  { %v421_v49 = vadd.f32 %v420_v16, %v1778_v39  ;;  %v449_v9 = vpop.f32.mrf.mxu3  ;;  %v1796_v50 = vpop.f32.mrf.mxu1  ;;  %v470_v13 = vadd.f32 %v1792_v0, %v1780_v44 }
 0x13f   :  { %v450_v1 = vadd.f32 %v449_v9, %v1778_v39  ;;  %v1221_v51 = vpop.eup %1220  ;;  %v499_v14 = vadd.f32 %v1796_v50, %v1780_v44 }
 0x140   :  { %1232 = vtanh.f32 %v421_v49  ;;  %v1223_v7 = vpop.eup %1222  ;;  %652 = vmatpush.msra.mxu0 %v1221_v51 }
 0x141   :  { %1234 = vtanh.f32 %v450_v1  ;;  %v1225_v31 = vpop.eup %1224  ;;  %681 = vmatpush.msra.mxu1 %v1223_v7 }
 0x142   :  { %1236 = vtanh.f32 %v418_v40  ;;  %v1227_v57 = vpop.eup %1226  ;;  %653 = vmatpush.msra.mxu0 %v1225_v31 }
 0x143   :  { %1238 = vtanh.f32 %v447_v42  ;;  %v1229_v41 = vpop.eup %1228  ;;  %682 = vmatpush.msra.mxu1 %v1227_v57 }
 0x144   :  { %1240 = vtanh.f32 %v415_v52  ;;  %v1231_v4 = vpop.eup %1230  ;;  %654 = vmatpush.msra.mxu0 %v1229_v41 }
 0x145   :  { %1242 = vtanh.f32 %v444_v21  ;;  %v1804_v30 = vpop.f32.mrf.mxu2  ;;  %v472_v46 = vpop.f32.mrf.mxu0  ;;  %683 = vmatpush.msra.mxu1 %v1231_v4 }
 0x146   :  { %v1233_v47 = vpop.eup %1232  ;;  %1244 = vtanh.f32 %v412_v53  ;;  %v1806_v8 = vpop.f32.mrf.mxu3  ;;  %655 = vmatpush.msra.mxu0 %v1217_v35  ;;  %v473_v24 = vadd.f32 %v472_v46, %v1787_v56 }
 0x147   :  { %v501_v61 = vpop.f32.mrf.mxu1  ;;  %v1235_v48 = vpop.eup %1234  ;;  %1246 = vtanh.f32 %v441_v37  ;;  %710 = vmatpush.msra.mxu2 %v1233_v47  ;;  %684 = vmatpush.msra.mxu1 %v1219_v17  ;;  %v557_v50 = vadd.f32 %v1806_v8, %v1780_v44 }
 0x148   :  { %v1237_v54 = vpop.eup %1236  ;;  %739 = vmatpush.msra.mxu3 %v1235_v48  ;;  %1109 = vmatmul.msk.f32.vlgmr.msra.gmra.mxu0 %vm323_vm0, %v1811_v34  ;;  %1248 = vtanh.f32 %v470_v13  ;;  %v502_v63 = vadd.f32 %v501_v61, %v1787_v56 }
 0x149   :  { %v1239_v55 = vpop.eup %1238  ;;  %1113 = vmatmul.msk.f32.vlgmr.msra.gmra.mxu1 %vm323_vm0, %v1811_v34  ;;  %711 = vmatpush.msra.mxu2 %v1237_v54  ;;  %1250 = vtanh.f32 %v499_v14 }
 0x14a   :  { %v1241_v60 = vpop.eup %1240  ;;  %740 = vmatpush.msra.mxu3 %v1239_v55  ;;  %v1914_v55 = vpop.permute.xlu0 %610 }
 0x14b   :  { %v1243_v5 = vpop.eup %1242  ;;  %712 = vmatpush.msra.mxu2 %v1241_v60 }
 0x14c   :  { %v1245_v29 = vpop.eup %1244  ;;  %741 = vmatpush.msra.mxu3 %v1243_v5  ;;  %v1917_v5 = vpop.permute.xlu1 %615 }
 0x14d   :  { %v1247_v6 = vpop.eup %1246  ;;  %v530_v62 = vpop.f32.mrf.mxu2  ;;  %713 = vmatpush.msra.mxu2 %v1245_v29 }
 0x14e   :  { %v475_v58 = vpop.f32.mrf.mxu0  ;;  %v559_v10 = vpop.f32.mrf.mxu3  ;;  %742 = vmatpush.msra.mxu3 %v1247_v6  ;;  %1117 = vmatmul.msk.f32.vlgmr.msra.gmra.mxu2 %vm323_vm0, %v1811_v34  ;;  %v531_v35 = vadd.f32 %v530_v62, %v1787_v56 }
 0x14f   :  { %v504_v11 = vpop.f32.mrf.mxu1  ;;  %1121 = vmatmul.msk.f32.vlgmr.msra.gmra.mxu3 %vm323_vm0, %v1811_v34  ;;  %v476_v59 = vadd.f32 %v475_v58, %v1776_v19  ;;  %v1249_v43 = vpop.eup %1248  ;;  %v560_v40 = vadd.f32 %v559_v10, %v1787_v56 }
 0x150   :  { %1110 = vmatmul.msk.f32.gmra.mxu0 %vm323_vm0, %v1820_v2  ;;  %v505_v23 = vadd.f32 %v504_v11, %v1776_v19  ;;  %v1251_v32 = vpop.eup %1250  ;;  %v1922_v11 = vpop.permute.xlu2 %620 }
 0x151   :  { %1114 = vmatmul.msk.f32.gmra.mxu1 %vm323_vm0, %v1820_v2 }
 0x155   :  { %v533_v3 = vpop.f32.mrf.mxu2 }
 0x156   :  { %v478_v18 = vpop.f32.mrf.mxu0  ;;  %v562_v28 = vpop.f32.mrf.mxu3  ;;  %1118 = vmatmul.msk.f32.gmra.mxu2 %vm323_vm0, %v1820_v2  ;;  %v534_v15 = vadd.f32 %v533_v3, %v1776_v19 }
 0x157   :  { %v479_v33 = vadd.f32 %v478_v18, %v1778_v39  ;;  %v507_v38 = vpop.f32.mrf.mxu1  ;;  %1122 = vmatmul.msk.f32.gmra.mxu3 %vm323_vm0, %v1820_v2  ;;  %v563_v16 = vadd.f32 %v562_v28, %v1776_v19  ;;  %v528_v19 = vadd.f32 %v1804_v30, %v1780_v44 }
 0x158   :  { %v508_v20 = vadd.f32 %v507_v38, %v1778_v39  ;;  %1111 = vmatmul.msk.f32.gmra.mxu0 %vm323_vm0, %v1838_v22  ;;  %v1929_v38 = vpop.permute.xlu0 %625 }
 0x159   :  { %1115 = vmatmul.msk.f32.gmra.mxu1 %vm323_vm0, %v1838_v22  ;;  %1252 = vtanh.f32 %v479_v33 }
 0x15a   :  { %1254 = vtanh.f32 %v508_v20 }
 0x15b   :  { %1256 = vtanh.f32 %v476_v59 }
 0x15c   :  { %1258 = vtanh.f32 %v505_v23 }
 0x15d   :  { %v536_v26 = vpop.f32.mrf.mxu2  ;;  %1260 = vtanh.f32 %v473_v24 }
 0x15e   :  { %v537_v25 = vadd.f32 %v536_v26, %v1778_v39  ;;  %v565_v36 = vpop.f32.mrf.mxu3  ;;  %1262 = vtanh.f32 %v502_v63  ;;  %1119 = vmatmul.msk.f32.gmra.mxu2 %vm323_vm0, %v1838_v22 }
 0x15f   :  { %v566_v27 = vadd.f32 %v565_v36, %v1778_v39  ;;  %1123 = vmatmul.msk.f32.gmra.mxu3 %vm323_vm0, %v1838_v22  ;;  %v1253_v12 = vpop.eup %1252 }
 0x160   :  { %1264 = vtanh.f32 %v537_v25  ;;  %v1255_v0 = vpop.eup %1254  ;;  %1112 = vmatmul.msk.f32.gmra.mxu0 %vm323_vm0, %v1857_v45 }
 0x161   :  { %1266 = vtanh.f32 %v566_v27  ;;  %1116 = vmatmul.msk.f32.gmra.mxu1 %vm323_vm0, %v1857_v45  ;;  %v1257_v39 = vpop.eup %1256  ;;  %768 = vmatpush.msrb.mxu0 %v1253_v12 }
 0x162   :  { %797 = vmatpush.msrb.mxu1 %v1255_v0  ;;  %v1259_v49 = vpop.eup %1258  ;;  %1268 = vtanh.f32 %v534_v15 }
 0x163   :  { %v1261_v9 = vpop.eup %1260  ;;  %1270 = vtanh.f32 %v563_v16  ;;  %769 = vmatpush.msrb.mxu0 %v1257_v39 }
 0x164   :  { %798 = vmatpush.msrb.mxu1 %v1259_v49  ;;  %v1263_v17 = vpop.eup %1262  ;;  %1272 = vtanh.f32 %v531_v35 }
 0x165   :  { %1274 = vtanh.f32 %v560_v40  ;;  %770 = vmatpush.msrb.mxu0 %v1261_v9 }
 0x166   :  { %v1265_v42 = vpop.eup %1264  ;;  %799 = vmatpush.msrb.mxu1 %v1263_v17  ;;  %1276 = vtanh.f32 %v528_v19  ;;  %1120 = vmatmul.msk.f32.gmra.mxu2 %vm323_vm0, %v1857_v45  ;;  %v1947_v19 = vpop.permute.xlu2 %915 }
 0x167   :  { %v1267_v56 = vpop.eup %1266  ;;  %1124 = vmatmul.msk.f32.gmra.mxu3 %vm323_vm0, %v1857_v45  ;;  %1278 = vtanh.f32 %v557_v50  ;;  %771 = vmatpush.msrb.mxu0 %v1249_v43 }
 0x168   :  { %800 = vmatpush.msrb.mxu1 %v1251_v32  ;;  %v1269_v44 = vpop.eup %1268  ;;  %826 = vmatpush.msrb.mxu2 %v1265_v42 }
 0x169   :  { %855 = vmatpush.msrb.mxu3 %v1267_v56  ;;  %v1271_v1 = vpop.eup %1270  ;;  %1125 = vmatmul.msk.f32.vlgmr.msrb.gmra.mxu0 %vm323_vm0, %v1811_v34 }
 0x16a   :  { %1129 = vmatmul.msk.f32.vlgmr.msrb.gmra.mxu1 %vm323_vm0, %v1811_v34  ;;  %v1273_v51 = vpop.eup %1272  ;;  %827 = vmatpush.msrb.mxu2 %v1269_v44 }
 0x16b   :  { %856 = vmatpush.msrb.mxu3 %v1271_v1  ;;  %v1275_v52 = vpop.eup %1274 }
 0x16c   :  { %v1277_v7 = vpop.eup %1276  ;;  %828 = vmatpush.msrb.mxu2 %v1273_v51 }
 0x16d   :  { %857 = vmatpush.msrb.mxu3 %v1275_v52  ;;  %v1279_v21 = vpop.eup %1278 }
 0x16e   :  { %829 = vmatpush.msrb.mxu2 %v1277_v7 }
 0x16f   :  { %858 = vmatpush.msrb.mxu3 %v1279_v21  ;;  %1133 = vmatmul.msk.f32.vlgmr.msrb.gmra.mxu2 %vm323_vm0, %v1811_v34 }
 0x170   :  { %1137 = vmatmul.msk.f32.vlgmr.msrb.gmra.mxu3 %vm323_vm0, %v1811_v34 }
 0x171   :  { %1126 = vmatmul.msk.f32.gmra.mxu0 %vm323_vm0, %v1820_v2 }
 0x172   :  { %1130 = vmatmul.msk.f32.gmra.mxu1 %vm323_vm0, %v1820_v2 }
 0x177   :  { %1134 = vmatmul.msk.f32.gmra.mxu2 %vm323_vm0, %v1820_v2 }
 0x178   :  { %1138 = vmatmul.msk.f32.gmra.mxu3 %vm323_vm0, %v1820_v2 }
 0x179   :  { %1127 = vmatmul.msk.f32.gmra.mxu0 %vm323_vm0, %v1838_v22 }
 0x17a   :  { %1131 = vmatmul.msk.f32.gmra.mxu1 %vm323_vm0, %v1838_v22 }
 0x17f   :  { %1135 = vmatmul.msk.f32.gmra.mxu2 %vm323_vm0, %v1838_v22 }
 0x180   :  { %1139 = vmatmul.msk.f32.gmra.mxu3 %vm323_vm0, %v1838_v22 }
 0x181   :  { %1128 = vmatmul.msk.f32.gmra.mxu0 %vm323_vm0, %v1857_v45 }
 0x182   :  { %1132 = vmatmul.msk.f32.gmra.mxu1 %vm323_vm0, %v1857_v45 }
 0x187   :  { %1136 = vmatmul.msk.f32.gmra.mxu2 %vm323_vm0, %v1857_v45 }
 0x188   :  { %1140 = vmatmul.msk.f32.gmra.mxu3 %vm323_vm0, %v1857_v45  ;;  %v1939_v45 = vpop.permute.xlu1 %910 }
 0x1c5   :  { %v657_v31 = vpop.f32.mrf.mxu0 }
 0x1c6   :  { %v686_v53 = vpop.f32.mrf.mxu1  ;;  %v658_v60 = vadd.f32 %v657_v31, %v1914_v55  ;;  %v1954_v31 = vpop.permute.xlu0 %920 }
 0x1c7   :  { %v687_v29 = vadd.f32 %v686_v53, %v1914_v55 }
 0x1c8   :  { %1280 = vtanh.f32 %v658_v60 }
 0x1c9   :  { %1282 = vtanh.f32 %v687_v29 }
 0x1cd   :  { %v660_v57 = vpop.f32.mrf.mxu0 }
 0x1ce   :  { %v689_v37 = vpop.f32.mrf.mxu1  ;;  %v661_v6 = vadd.f32 %v660_v57, %v1917_v5  ;;  %v1932_v20 = vpop.eup %1280 }
 0x1cf   :  { %v690_v10 = vadd.f32 %v689_v37, %v1917_v5  ;;  %v1283_v63 = vpop.eup %1282 }
 0x1d0   :  { %1284 = vtanh.f32 %v661_v6  ;;  %v929_v53 = vmul.f32 %v1283_v63, %v1939_v45 }
 0x1d1   :  { %v715_v41 = vpop.f32.mrf.mxu2  ;;  %1286 = vtanh.f32 %v690_v10 }
 0x1d2   :  { %v744_v4 = vpop.f32.mrf.mxu3  ;;  %v716_v2 = vadd.f32 %v715_v41, %v1914_v55 }
 0x1d3   :  { %v745_v13 = vadd.f32 %v744_v4, %v1914_v55 }
 0x1d4   :  { %1288 = vtanh.f32 %v716_v2 }
 0x1d5   :  { %v663_v30 = vpop.f32.mrf.mxu0  ;;  %1290 = vtanh.f32 %v745_v13 }
 0x1d6   :  { %v692_v46 = vpop.f32.mrf.mxu1  ;;  %v664_v18 = vadd.f32 %v663_v30, %v1922_v11  ;;  %v1936_v43 = vpop.eup %1284 }
 0x1d7   :  { %v693_v28 = vadd.f32 %v692_v46, %v1922_v11  ;;  %v1287_v36 = vpop.eup %1286 }
 0x1d8   :  { %1292 = vtanh.f32 %v664_v18  ;;  %v937_v1 = vmul.f32 %v1287_v36, %v1947_v19 }
 0x1d9   :  { %v718_v47 = vpop.f32.mrf.mxu2  ;;  %1294 = vtanh.f32 %v693_v28 }
 0x1da   :  { %v747_v8 = vpop.f32.mrf.mxu3  ;;  %v719_v33 = vadd.f32 %v718_v47, %v1917_v5  ;;  %v1289_v15 = vpop.eup %1288 }
 0x1db   :  { %v748_v22 = vadd.f32 %v747_v8, %v1917_v5  ;;  %v1291_v0 = vpop.eup %1290  ;;  %v930_v60 = vmul.f32 %v1289_v15, %v1939_v45 }
 0x1dc   :  { %1296 = vtanh.f32 %v719_v33 }
 0x1dd   :  { %v1912_v61 = vpop.f32.mrf.mxu0  ;;  %1298 = vtanh.f32 %v748_v22 }
 0x1de   :  { %v695_v34 = vpop.f32.mrf.mxu1  ;;  %v1293_v39 = vpop.eup %1292  ;;  %v667_v57 = vadd.f32 %v1912_v61, %v1929_v38  ;;  %v931_v61 = vmul.f32 %v1291_v0, %v1939_v45 }
 0x1df   :  { %v696_v59 = vadd.f32 %v695_v34, %v1929_v38  ;;  %v1295_v49 = vpop.eup %1294  ;;  %v969_v34 = vadd.f32 %v937_v1, %v929_v53 }
 0x1e0   :  { %v945_v41 = vmul.f32 %v1295_v49, %v1954_v31 }
 0x1e1   :  { %v721_v48 = vpop.f32.mrf.mxu2  ;;  %1300 = vtanh.f32 %v696_v59 }
 0x1e2   :  { %v750_v54 = vpop.f32.mrf.mxu3  ;;  %v722_v26 = vadd.f32 %v721_v48, %v1922_v11  ;;  %v1297_v50 = vpop.eup %1296  ;;  %v970_v13 = vadd.f32 %v969_v34, %v945_v41 }
 0x1e3   :  { %v751_v25 = vadd.f32 %v750_v54, %v1922_v11  ;;  %v1299_v44 = vpop.eup %1298  ;;  %v938_v4 = vmul.f32 %v1297_v50, %v1947_v19  ;;  %v1962_v54 = vpop.permute.xlu1 %925 }
 0x1e4   :  { %1302 = vtanh.f32 %v722_v26  ;;  %v939_v30 = vmul.f32 %v1299_v44, %v1947_v19  ;;  %v936_v26 = vmul.f32 %v1936_v43, %v1947_v19 }
 0x1e5   :  { %1304 = vtanh.f32 %v751_v25  ;;  %v944_v25 = vmul.f32 %v1293_v39, %v1954_v31 }
 0x1e6   :  { %v773_v62 = vpop.f32.mrf.mxu0 }
 0x1e7   :  { %v802_v58 = vpop.f32.mrf.mxu1  ;;  %v774_v35 = vadd.f32 %v773_v62, %v1914_v55  ;;  %v1301_v52 = vpop.eup %1300  ;;  %v928_v62 = vmul.f32 %v1932_v20, %v1939_v45 }
 0x1e8   :  { %v803_v40 = vadd.f32 %v802_v58, %v1914_v55  ;;  %v953_v58 = vmul.f32 %v1301_v52, %v1962_v54 }
 0x1e9   :  { %v724_v14 = vpop.f32.mrf.mxu2  ;;  %v960_v1 = vadd.f32 %v936_v26, %v928_v62 }
 0x1ea   :  { %v753_v3 = vpop.f32.mrf.mxu3  ;;  %v725_v32 = vadd.f32 %v724_v14, %v1929_v38  ;;  %v1303_v21 = vpop.eup %1302  ;;  %v978_v14 = vadd.f32 %v938_v4, %v930_v60 }
 0x1eb   :  { %v754_v27 = vadd.f32 %v753_v3, %v1929_v38  ;;  %v1305_v37 = vpop.eup %1304  ;;  %v946_v29 = vmul.f32 %v1303_v21, %v1954_v31  ;;  %v987_v3 = vadd.f32 %v939_v30, %v931_v61 }
 0x1ec   :  { %1306 = vtanh.f32 %v725_v32  ;;  %v947_v10 = vmul.f32 %v1305_v37, %v1954_v31 }
 0x1ed   :  { %1308 = vtanh.f32 %v754_v27  ;;  %v979_v36 = vadd.f32 %v978_v14, %v946_v29  ;;  %v971_v27 = vadd.f32 %v970_v13, %v953_v58 }
 0x1ee   :  { %v776_v23 = vpop.f32.mrf.mxu0  ;;  %1310 = vtanh.f32 %v774_v35  ;;  %v988_v0 = vadd.f32 %v987_v3, %v947_v10 }
 0x1ef   :  { %v805_v24 = vpop.f32.mrf.mxu1  ;;  %v777_v9 = vadd.f32 %v776_v23, %v1917_v5  ;;  %1312 = vtanh.f32 %v803_v40  ;;  %v972_v30 = vrot.slane %v971_v27, 4 }
 0x1f0   :  { %v806_v17 = vadd.f32 %v805_v24, %v1917_v5 }
 0x1f1   :  { %1314 = vtanh.f32 %v777_v9 }
 0x1f2   :  { %v831_v12 = vpop.f32.mrf.mxu2  ;;  %1316 = vtanh.f32 %v806_v17  ;;  %v1307_v8 = vpop.eup %1306 }
 0x1f3   :  { %v1943_v16 = vpop.f32.mrf.mxu3  ;;  %v1309_v48 = vpop.eup %1308  ;;  %v954_v18 = vmul.f32 %v1307_v8, %v1962_v54  ;;  %v832_v23 = vadd.f32 %v831_v12, %v1914_v55 }
 0x1f4   :  { %v1311_v6 = vpop.eup %1310  ;;  %v955_v59 = vmul.f32 %v1309_v48, %v1962_v54  ;;  %v861_v32 = vadd.f32 %v1943_v16, %v1914_v55 }
 0x1f5   :  { %v1313_v2 = vpop.eup %1312  ;;  %v980_v40 = vadd.f32 %v979_v36, %v954_v18  ;;  %v932_v16 = vmul.f32 %v1311_v6, %v1939_v45  ;;  %v973_v18 = vadd.f32 %v972_v30, %v971_v27 }
 0x1f6   :  { %v779_v42 = vpop.f32.mrf.mxu0  ;;  %v989_v17 = vadd.f32 %v988_v0, %v955_v59 }
 0x1f7   :  { %v808_v56 = vpop.f32.mrf.mxu1  ;;  %v780_v51 = vadd.f32 %v779_v42, %v1922_v11  ;;  %v1315_v22 = vpop.eup %1314 }
 0x1f8   :  { %v809_v7 = vadd.f32 %v808_v56, %v1922_v11  ;;  %v1317_v63 = vpop.eup %1316  ;;  %v940_v49 = vmul.f32 %v1315_v22, %v1947_v19  ;;  %v990_v37 = vrot.slane %v989_v17, 4 }
 0x1f9   :  { %1318 = vtanh.f32 %v780_v51  ;;  %v941_v42 = vmul.f32 %v1317_v63, %v1947_v19 }
 0x1fa   :  { %v834_v46 = vpop.f32.mrf.mxu2  ;;  %1320 = vtanh.f32 %v809_v7  ;;  %v981_v7 = vrot.slane %v980_v40, 4  ;;  %v996_v21 = vadd.f32 %v940_v49, %v932_v16  ;;  %v991_v10 = vadd.f32 %v990_v37, %v989_v17 }
 0x1fb   :  { %v863_v47 = vpop.f32.mrf.mxu3  ;;  %1322 = vtanh.f32 %v667_v57  ;;  %v835_v35 = vadd.f32 %v834_v46, %v1917_v5  ;;  %v961_v57 = vadd.f32 %v960_v1, %v944_v25 }
 0x1fc   :  { %v864_v9 = vadd.f32 %v863_v47, %v1917_v5  ;;  %v933_v5 = vmul.f32 %v1313_v2, %v1939_v45  ;;  %v982_v61 = vadd.f32 %v981_v7, %v980_v40  ;;  %v992_v26 = vrot.slane %v991_v10, 2 }
 0x1fe   :  { %v782_v28 = vpop.f32.mrf.mxu0  ;;  %v1005_v41 = vadd.f32 %v941_v42, %v933_v5  ;;  %v983_v63 = vrot.slane %v982_v61, 2 }
 0x1ff   :  { %v811_v33 = vpop.f32.mrf.mxu1  ;;  %v783_v20 = vadd.f32 %v782_v28, %v1929_v38  ;;  %v1319_v15 = vpop.eup %1318 }
 0x200   :  { %v812_v24 = vadd.f32 %v811_v33, %v1929_v38  ;;  %v1321_v12 = vpop.eup %1320  ;;  %v948_v56 = vmul.f32 %v1319_v15, %v1954_v31 }
 0x201   :  { %1324 = vtanh.f32 %v783_v20  ;;  %v1323_v39 = vpop.eup %1322  ;;  %v949_v51 = vmul.f32 %v1321_v12, %v1954_v31 }
 0x202   :  { %1326 = vtanh.f32 %v812_v24  ;;  %v837_v43 = vpop.f32.mrf.mxu2  ;;  %v952_v52 = vmul.f32 %v1323_v39, %v1962_v54  ;;  %v997_v46 = vadd.f32 %v996_v21, %v948_v56 }
 0x203   :  { %v866_v50 = vpop.f32.mrf.mxu3  ;;  %1328 = vtanh.f32 %v832_v23  ;;  %v838_v55 = vadd.f32 %v837_v43, %v1922_v11  ;;  %v1006_v8 = vadd.f32 %v1005_v41, %v949_v51  ;;  %v984_v43 = vadd.f32 %v983_v63, %v982_v61 }
 0x204   :  { %1330 = vtanh.f32 %v861_v32  ;;  %v867_v44 = vadd.f32 %v866_v50, %v1922_v11  ;;  %v962_v60 = vadd.f32 %v961_v57, %v952_v52  ;;  %v974_v32 = vrot.slane %v973_v18, 2 }
 0x205   :  { %1332 = vtanh.f32 %v835_v35  ;;  %v993_v50 = vadd.f32 %v992_v26, %v991_v10  ;;  %v985_v51 = vrot.slane %v984_v43, 1 }
 0x206   :  { %1334 = vtanh.f32 %v864_v9  ;;  %v963_v23 = vrot.slane %v962_v60, 4 }
 0x207   :  { %v1325_v53 = vpop.eup %1324  ;;  %1336 = vtanh.f32 %v838_v55  ;;  %v986_v30 = vadd.f32 %v985_v51, %v984_v43 }
 0x208   :  { %v1327_v4 = vpop.eup %1326  ;;  %v956_v11 = vmul.f32 %v1325_v53, %v1962_v54  ;;  %1338 = vtanh.f32 %v867_v44  ;;  %v964_v9 = vadd.f32 %v963_v23, %v962_v60  ;;  %v1032_v60 = vstv %s2019_s0 }
 0x209   :  { %v1329_v47 = vpop.eup %1328  ;;  %v957_v34 = vmul.f32 %v1327_v4, %v1962_v54 }
 0x20a   :  { %v1331_v48 = vpop.eup %1330  ;;  %v998_v29 = vadd.f32 %v997_v46, %v956_v11  ;;  %v840_v6 = vpop.f32.mrf.mxu2  ;;  %v965_v5 = vrot.slane %v964_v9, 2 }
 0x20b   :  { %v869_v62 = vpop.f32.mrf.mxu3  ;;  %v1333_v58 = vpop.eup %1332  ;;  %v1007_v2 = vadd.f32 %v1006_v8, %v957_v34  ;;  %v841_v13 = vadd.f32 %v840_v6, %v1929_v38  ;;  %v935_v27 = vmul.f32 %v1331_v48, %v1939_v45  ;;  %v1035_v6 = vadd.f32 %v1032_v60, %v986_v30 }
 0x20c   :  { %v870_v14 = vadd.f32 %v869_v62, %v1929_v38  ;;  %v1335_v3 = vpop.eup %1334  ;;  %v999_v28 = vrot.slane %v998_v29, 4  ;;  %v942_v20 = vmul.f32 %v1333_v58, %v1947_v19  ;;  %v934_v38 = vmul.f32 %v1329_v47, %v1939_v45 }
 0x20d   :  { %v1337_v33 = vpop.eup %1336  ;;  %v1008_v22 = vrot.slane %v1007_v2, 4  ;;  %1340 = vtanh.f32 %v841_v13  ;;  %v943_v25 = vmul.f32 %v1335_v3, %v1947_v19  ;;  %v975_v19 = vadd.f32 %v974_v32, %v973_v18 }
 0x20e   :  { %v1339_v59 = vpop.eup %1338  ;;  %v1000_v24 = vadd.f32 %v999_v28, %v998_v29  ;;  %1342 = vtanh.f32 %v870_v14  ;;  %v950_v15 = vmul.f32 %v1337_v33, %v1954_v31  ;;  %v1014_v40 = vadd.f32 %v942_v20, %v934_v38 }
 0x20f   :  { %v1009_v36 = vadd.f32 %v1008_v22, %v1007_v2  ;;  %v951_v12 = vmul.f32 %v1339_v59, %v1954_v31  ;;  %v1023_v39 = vadd.f32 %v943_v25, %v935_v27  ;;  %v994_v31 = vrot.slane %v993_v50, 1 }
 0x210   :  { %v1001_v0 = vrot.slane %v1000_v24, 2  ;;  %v1015_v42 = vadd.f32 %v1014_v40, %v950_v15  ;;  %v976_v21 = vrot.slane %v975_v19, 1  ;;  %v966_v4 = vadd.f32 %v965_v5, %v964_v9 }
 0x211   :  { %v1010_v35 = vrot.slane %v1009_v36, 2  ;;  %v1024_v44 = vadd.f32 %v1023_v39, %v951_v12  ;;  %v995_v46 = vadd.f32 %v994_v31, %v993_v50  ;;  %v1050_v33 = vrot.slane %v1035_v6, 6 }
 0x212   :  { %v1002_v16 = vadd.f32 %v1001_v0, %v1000_v24  ;;  %v977_v8 = vadd.f32 %v976_v21, %v975_v19  ;;  %v967_v29 = vrot.slane %v966_v4, 1 }
 0x213   :  { %v1341_v49 = vpop.eup %1340  ;;  %v1011_v56 = vadd.f32 %v1010_v35, %v1009_v36  ;;  %v1036_v62 = vadd.f32 %v1032_v60, %v995_v46 }
 0x214   :  { %v1343_v17 = vpop.eup %1342  ;;  %v958_v55 = vmul.f32 %v1341_v49, %v1962_v54  ;;  %v1003_v53 = vrot.slane %v1002_v16, 1  ;;  %v1034_v2 = vadd.f32 %v1032_v60, %v977_v8  ;;  %v968_v28 = vadd.f32 %v967_v29, %v966_v4 }
 0x215   :  { %v959_v45 = vmul.f32 %v1343_v17, %v1962_v54  ;;  %v1012_v57 = vrot.slane %v1011_v56, 1  ;;  %v1051_v22 = vrot.slane %v1036_v62, 5 }
 0x216   :  { %v1016_v1 = vadd.f32 %v1015_v42, %v958_v55  ;;  %v1004_v34 = vadd.f32 %v1003_v53, %v1002_v16  ;;  %v1049_v20 = vrot.slane %v1034_v2, 7  ;;  %v1033_v36 = vadd.f32 %v1032_v60, %v968_v28 }
 0x217   :  { %v1025_v52 = vadd.f32 %v1024_v44, %v959_v45  ;;  %v1013_v48 = vadd.f32 %v1012_v57, %v1011_v56  ;;  %v1059_v32 = vsel %vm1058_vm2, %v1050_v33, %v1051_v22 }
 0x218   :  { %v1017_v7 = vrot.slane %v1016_v1, 4  ;;  %v1037_v13 = vadd.f32 %v1032_v60, %v1004_v34  ;;  %v1057_v15 = vsel %vm1056_vm1, %v1033_v36, %v1049_v20 }
 0x219   :  { %v1026_v37 = vrot.slane %v1025_v52, 4  ;;  %v1038_v14 = vadd.f32 %v1032_v60, %v1013_v48  ;;  %v1061_v35 = vsel %vm1060_vm3, %v1057_v15, %v1059_v32 }
 0x21a   :  { %v1018_v41 = vadd.f32 %v1017_v7, %v1016_v1  ;;  %v1052_v24 = vrot.slane %v1037_v13, 4 }
 0x21b   :  { %v1027_v11 = vadd.f32 %v1026_v37, %v1025_v52  ;;  %v1053_v63 = vrot.slane %v1038_v14, 3 }
 0x21c   :  { %v1019_v47 = vrot.slane %v1018_v41, 2 }
 0x21d   :  { %v1028_v54 = vrot.slane %v1027_v11, 2  ;;  %v1063_v27 = vsel %vm1062_vm4, %v1052_v24, %v1053_v63 }
 0x21e   :  { %v1020_v61 = vadd.f32 %v1019_v47, %v1018_v41 }
 0x21f   :  { %v1029_v58 = vadd.f32 %v1028_v54, %v1027_v11 }
 0x220   :  { %v1021_v10 = vrot.slane %v1020_v61, 1 }
 0x221   :  { %v1030_v3 = vrot.slane %v1029_v58, 1 }
 0x222   :  { %v1022_v18 = vadd.f32 %v1021_v10, %v1020_v61 }
 0x223   :  { %v1031_v59 = vadd.f32 %v1030_v3, %v1029_v58 }
 0x224   :  { %v1039_v23 = vadd.f32 %v1032_v60, %v1022_v18 }
 0x225   :  { %v1040_v26 = vadd.f32 %v1032_v60, %v1031_v59 }
 0x226   :  { %v1054_v25 = vrot.slane %v1039_v23, 2 }
 0x227   :  { %v1055_v38 = vrot.slane %v1040_v26, 1 }
 0x229   :  { %v1065_v0 = vsel %vm1064_vm5, %v1054_v25, %v1055_v38 }
 0x22a   :  { %v1067_v12 = vsel %vm1066_vm6, %v1063_v27, %v1065_v0 }
 0x22b   :  { %v1069_v40 = vsel %vm1068_vm7, %v1061_v35, %v1067_v12 }
 0x22c   :  { %1071 = vst [vmem:[%s2020_s9] sm:$0xff] %v1069_v40 }

</bundles_post_ra>
